<compile_context>
chip_gen: v7x
topology: tpu7x:2x2x1
jax: 0.10.0
libtpu: 0.0.40
codegen_flags: <defaults>
</compile_context>

<pallas_src>
import math

import jax
import jax.numpy as jnp
from jax.experimental import pallas as pl
from jax.experimental.pallas import tpu as pltpu


# --------------------------------------------------------------------------------------
# Pallas kernel
# --------------------------------------------------------------------------------------
def _quantlinear_kernel(x_ref, qw_ref, s_ref, zs_ref, b_ref, o_ref, acc_ref):
    """One (tm, tn) output tile; loops over K via grid axis 2 (last, 'arbitrary')."""
    k_step = pl.program_id(2)

    @pl.when(k_step == 0)
    def _init():
        acc_ref[...] = jnp.zeros_like(acc_ref)

    # ---- unpack the 4-bit weights of this K tile: pure VPU shift+mask, unpacked along sublanes ----
    qw = qw_ref[...]                      # (tk//8, tn) int32, 8 nibbles along K per word
    tk8, tn = qw.shape
    tk = tk8 * 8
    ng = s_ref.shape[0]                   # groups covered by this K tile
    gs = tk // ng                         # group_size (static)

    # shift = 0,4,...,28 along the new sublane axis; arithmetic shift is fine because of the mask.
    shift = jax.lax.broadcasted_iota(jnp.int32, (1, 8, 1), 1) * 4
    nib = (qw[:, None, :] >> shift) & 0xF                     # (tk//8, 8, tn)
    w_q = nib.reshape(tk, tn).astype(jnp.float32)             # layout-preserving merge (8 = sublane)

    # ---- expand per-group scale and (zero+1)*scale to per-k rows ONCE per tile ----
    s = jnp.broadcast_to(s_ref[...][:, None, :], (ng, gs, tn)).reshape(tk, tn)
    zs = jnp.broadcast_to(zs_ref[...][:, None, :], (ng, gs, tn)).reshape(tk, tn)

    # Dequantize:  W = q * s - (z + 1) * s   (zs precomputed outside the kernel), then bf16 for MXU.
    w = (w_q * s - zs).astype(jnp.bfloat16)                   # (tk, tn)

    acc_ref[...] += jnp.dot(x_ref[...], w, preferred_element_type=jnp.float32)

    @pl.when(k_step == pl.num_programs(2) - 1)
    def _finalize():
        # Bias is fused into the existing writeback; cast once from the f32 accumulator.
        o_ref[...] = (acc_ref[...] + b_ref[...]).astype(o_ref.dtype)


# --------------------------------------------------------------------------------------
# Host-side helpers (tiny, run once per call; analogue of post_init / make_q_matrix)
# --------------------------------------------------------------------------------------
def _round_up(x, m):
    return (x + m - 1) // m * m


def _pick_tile(full, target, step):
    """Largest multiple of `step` that divides `full` and is <= max(target, step); else `full`."""
    if full % step != 0:
        return full
    t = max(step, (min(target, full) // step) * step)
    while t > step and full % t != 0:
        t -= step
    return t if full % t == 0 else full


def _unpack_cols_int4(qzeros):
    """GPTQ qzeros (G, N//8) int32 -> (G, N) int32 zero points (without the +1)."""
    g, np8 = qzeros.shape
    u = jax.lax.bitcast_convert_type(qzeros, jnp.uint32)
    parts = [(u >> jnp.uint32(4 * j)) & jnp.uint32(0xF) for j in range(8)]
    z = jnp.stack(parts, axis=-1)                 # (G, N//8, 8); column n = 8*p + j
    return z.reshape(g, np8 * 8).astype(jnp.int32)


# --------------------------------------------------------------------------------------
# Public wrapper: QuantLinear.forward
# --------------------------------------------------------------------------------------
def quantlinear_forward(
    x,
    qweight,
    qzeros,
    scales,
    bias=None,
    group_size=128,
    *,
    block_m=256,
    block_n=256,
    block_k=2048,
    vmem_limit_bytes=None,
    interpret=False,
):
    """y = x @ dequant(qweight, qzeros, scales) + bias, returned as float16 (exllamav2 semantics).

    Only the trivial contiguous grouping (g_idx[i] = i // group_size) is supported, which is the
    path the torch module takes when g_idx is all-default.
    """
    *lead, K = x.shape
    kp8, N = qweight.shape
    if kp8 * 8 != K:
        raise ValueError("qweight.shape[0] must be infeatures // 8")
    gs = K if group_size in (-1, None) else int(group_size)
    if K % gs != 0 or gs % 8 != 0:
        raise ValueError("group_size must divide infeatures and be a multiple of 8")
    G = K // gs
    assert scales.shape == (G, N) and qzeros.shape == (G, N // 8)

    # -- tiny one-time prep: unpack zero points (packed along N) and fold the GPTQ '+1' and scale --
    z = _unpack_cols_int4(qzeros)                                  # (G, N) int32
    s_f32 = scales.astype(jnp.float32)                             # (G, N)
    zs_f32 = (z + 1).astype(jnp.float32) * s_f32                   # (G, N) == (zero+1)*scale
    b_f32 = (jnp.zeros((N,), jnp.float32) if bias is None
             else bias.astype(jnp.float32)).reshape(1, N)

    # MXU consumes bf16 natively; keep the packed weights as-is.
    x2 = x.reshape(-1, K).astype(jnp.bfloat16)
    M = x2.shape[0]

    # -- tile sizes (lane-dense N, K aligned to whole packed rows and whole groups) --
    tn = _pick_tile(N, block_n, 128) if N % 128 == 0 else N
    k_step = math.lcm(128, 8 * gs)
    tk = _pick_tile(K, block_k, k_step) if (K % k_step == 0 and K > k_step) else K
    tm = max(8, (min(block_m, _round_up(M, 8)) // 8) * 8)
    Mp = _round_up(M, tm)
    if Mp != M:
        x2 = jnp.pad(x2, ((0, Mp - M), (0, 0)))

    grid = (Mp // tm, N // tn, K // tk)

    cp_kwargs = dict(dimension_semantics=("parallel", "parallel", "arbitrary"))
    if vmem_limit_bytes is not None:
        cp_kwargs["vmem_limit_bytes"] = int(vmem_limit_bytes)
    _CompilerParams = getattr(pltpu, "CompilerParams", None) or getattr(pltpu, "TPUCompilerParams")
    compiler_params = _CompilerParams(**cp_kwargs)

    y = pl.pallas_call(
        _quantlinear_kernel,
        grid=grid,
        in_specs=[
            pl.BlockSpec((tm, tk), lambda i, j, k: (i, k)),              # x (bf16)
            pl.BlockSpec((tk // 8, tn), lambda i, j, k: (k, j)),         # qweight (packed int32)
            pl.BlockSpec((tk // gs, tn), lambda i, j, k: (k, j)),        # scales (f32)
            pl.BlockSpec((tk // gs, tn), lambda i, j, k: (k, j)),        # (zero+1)*scale (f32)
            pl.BlockSpec((1, tn), lambda i, j, k: (0, j)),               # bias (f32)
        ],
        out_specs=pl.BlockSpec((tm, tn), lambda i, j, k: (i, j)),
        out_shape=jax.ShapeDtypeStruct((Mp, N), jnp.bfloat16),
        scratch_shapes=[pltpu.VMEM((tm, tn), jnp.float32)],
        compiler_params=compiler_params,
        interpret=interpret,
    )(x2, qweight, s_f32, zs_f32, b_f32)

    # TODO(synk): the final fp16 cast is done here (kernel writes bf16) to avoid relying on
    # Mosaic f16 stores; fold it into the last-K epilogue once f16 I/O is confirmed on the target.
    # TODO(synk): non-trivial g_idx (act-order / q_perm path of make_q_matrix) is not implemented;
    # it would need scalar-prefetch-indexed scale/zero tiles.
    y = y[:M].astype(jnp.float16)
    return y.reshape(*lead, N)


# --------------------------------------------------------------------------------------
# Test-data packing helpers + pure-JAX reference (mirror of the exllamav2 dequant)
# --------------------------------------------------------------------------------------
def _pack_rows_int4(w_int):
    """(K, N) values in [0,16) -> GPTQ qweight (K//8, N) int32 (nibble j holds k = 8*row + j)."""
    K, N = w_int.shape
    w = w_int.astype(jnp.uint32).reshape(K // 8, 8, N)
    packed = jnp.zeros((K // 8, N), dtype=jnp.uint32)
    for j in range(8):
        packed = packed | (w[:, j, :] << jnp.uint32(4 * j))
    return jax.lax.bitcast_convert_type(packed, jnp.int32)


def _pack_cols_int4(z_int):
    """(G, N) values in [0,16) -> GPTQ qzeros (G, N//8) int32 (nibble j holds n = 8*col + j)."""
    G, N = z_int.shape
    z = z_int.astype(jnp.uint32).reshape(G, N // 8, 8)
    packed = jnp.zeros((G, N // 8), dtype=jnp.uint32)
    for j in range(8):
        packed = packed | (z[:, :, j] << jnp.uint32(4 * j))
    return jax.lax.bitcast_convert_type(packed, jnp.int32)


def _reference_forward(x, w_int, z_int, scales, bias, group_size):
    K, N = w_int.shape
    g = jnp.arange(K) // group_size
    s = scales.astype(jnp.float32)
    zs = (z_int + 1).astype(jnp.float32) * s
    w = (w_int.astype(jnp.float32) * s[g] - zs[g]).astype(jnp.bfloat16)
    x2 = x.reshape(-1, K).astype(jnp.bfloat16)
    y = jnp.dot(x2, w, preferred_element_type=jnp.float32)
    y = y + bias.astype(jnp.float32)[None, :]
    return y.astype(jnp.float16).reshape(x.shape[:-1] + (N,))


# --------------------------------------------------------------------------------------
# Demo / smoke test
# --------------------------------------------------------------------------------------
if __name__ == "__main__":
    batch, seq = 2, 8
    infeatures, outfeatures, group_size = 512, 256, 32   # small, multiples of 32 (no padding)

    key = jax.random.PRNGKey(0)
    k_x, k_w, k_z, k_s, k_b = jax.random.split(key, 5)

    x = jax.random.normal(k_x, (batch, seq, infeatures), dtype=jnp.float32).astype(jnp.float16)
    w_int = jax.random.randint(k_w, (infeatures, outfeatures), 0, 16, dtype=jnp.int32)
    z_int = jax.random.randint(k_z, (infeatures // group_size, outfeatures), 0, 16, dtype=jnp.int32)
    scales = jax.random.uniform(
        k_s, (infeatures // group_size, outfeatures), minval=0.005, maxval=0.02,
        dtype=jnp.float32).astype(jnp.float16)
    bias = (0.1 * jax.random.normal(k_b, (outfeatures,), dtype=jnp.float32)).astype(jnp.float16)

    qweight = _pack_rows_int4(w_int)    # (K//8, N) int32
    qzeros = _pack_cols_int4(z_int)     # (G, N//8) int32

    # block_k=256 -> two K steps, exercising the resident accumulator path.
    y = quantlinear_forward(
        x, qweight, qzeros, scales, bias, group_size,
        block_m=256, block_n=256, block_k=256)
    y = jax.block_until_ready(y)

    y_ref = _reference_forward(x, w_int, z_int, scales, bias, group_size)
    max_err = float(jnp.max(jnp.abs(y.astype(jnp.float32) - y_ref.astype(jnp.float32))))
    if not (max_err < 5e-2):
        raise AssertionError(f"mismatch vs reference: max abs err = {max_err}")
    print("KERNEL_OK")
</pallas_src>

<mosaic_0001>
module attributes {stable_mosaic.version = 11 : i64} {
  func.func @_quantlinear_kernel(%arg0: i32, %arg1: i32, %arg2: i32, %arg3: memref<16x256xbf16, #tpu.memory_space<vmem>>, %arg4: memref<32x256xi32, #tpu.memory_space<vmem>>, %arg5: memref<8x256xf32, #tpu.memory_space<vmem>>, %arg6: memref<8x256xf32, #tpu.memory_space<vmem>>, %arg7: memref<1x256xf32, #tpu.memory_space<vmem>>, %arg8: memref<16x256xbf16, #tpu.memory_space<vmem>>, %arg9: memref<16x256xf32, #tpu.memory_space<vmem>>) attributes {dimension_semantics = [#tpu.dimension_semantics<parallel>, #tpu.dimension_semantics<parallel>, #tpu.dimension_semantics<arbitrary>], iteration_bounds = array<i64: 1, 1, 2>, scalar_prefetch = 0 : i64, scratch_operands = 1 : i64, tpu.core_type = #tpu.core_type<tc>, window_params = [{transform_indices = @transform_0, window_bounds = array<i64: 16, 256>}, {transform_indices = @transform_1, window_bounds = array<i64: 32, 256>}, {transform_indices = @transform_2, window_bounds = array<i64: 8, 256>}, {transform_indices = @transform_3, window_bounds = array<i64: 8, 256>}, {transform_indices = @transform_4, window_bounds = array<i64: 1, 256>}, {transform_indices = @transform_5, window_bounds = array<i64: 16, 256>}]} {
    %c0_i32 = arith.constant 0 : i32
    %0 = arith.cmpi eq, %arg2, %c0_i32 : i32
    %1 = arith.extui %0 : i1 to i32
    %c0_i32_0 = arith.constant 0 : i32
    %2 = arith.cmpi ne, %1, %c0_i32_0 : i32
    scf.if %2 {
      %cst_13 = arith.constant 0.000000e+00 : f32
      %36 = vector.broadcast %cst_13 : f32 to vector<16x256xf32>
      %c0_14 = arith.constant 0 : index
      %c0_15 = arith.constant 0 : index
      %37 = vector.load %arg9[%c0_14, %c0_15] : memref<16x256xf32, #tpu.memory_space<vmem>>, vector<16x256xf32>
      tpu.vector_store %arg9[%c0_14, %c0_15], %36 {strides = array<i32>} : memref<16x256xf32, #tpu.memory_space<vmem>>, vector<16x256xf32>,
    } else {
    }
    %c0 = arith.constant 0 : index
    %c0_1 = arith.constant 0 : index
    %3 = vector.load %arg4[%c0, %c0_1] : memref<32x256xi32, #tpu.memory_space<vmem>>, vector<32x256xi32>
    %4 = tpu.iota {dimensions = array<i32: 1>} : vector<1x8x1xi32>
    %c4_i32 = arith.constant 4 : i32
    %5 = vector.broadcast %c4_i32 : i32 to vector<1x8x1xi32>
    %6 = arith.muli %4, %5 : vector<1x8x1xi32>
    %7 = vector.shape_cast %3 : vector<32x256xi32> to vector<32x1x256xi32>
    %8 = vector.broadcast %7 : vector<32x1x256xi32> to vector<32x8x256xi32>
    %9 = vector.broadcast %6 : vector<1x8x1xi32> to vector<32x8x256xi32>
    %10 = arith.shrsi %8, %9 : vector<32x8x256xi32>
    %c15_i32 = arith.constant 15 : i32
    %11 = vector.broadcast %c15_i32 : i32 to vector<32x8x256xi32>
    %12 = arith.andi %10, %11 : vector<32x8x256xi32>
    %13 = vector.shape_cast %12 : vector<32x8x256xi32> to vector<256x256xi32>
    %14 = arith.sitofp %13 : vector<256x256xi32> to vector<256x256xf32>
    %c0_2 = arith.constant 0 : index
    %c0_3 = arith.constant 0 : index
    %15 = vector.load %arg5[%c0_2, %c0_3] : memref<8x256xf32, #tpu.memory_space<vmem>>, vector<8x256xf32>
    %16 = vector.shape_cast %15 : vector<8x256xf32> to vector<8x1x256xf32>
    %17 = vector.shape_cast %16 : vector<8x1x256xf32> to vector<8x1x256xf32>
    %18 = vector.broadcast %17 : vector<8x1x256xf32> to vector<8x32x256xf32>
    %19 = vector.shape_cast %18 : vector<8x32x256xf32> to vector<256x256xf32>
    %c0_4 = arith.constant 0 : index
    %c0_5 = arith.constant 0 : index
    %20 = vector.load %arg6[%c0_4, %c0_5] : memref<8x256xf32, #tpu.memory_space<vmem>>, vector<8x256xf32>
    %21 = vector.shape_cast %20 : vector<8x256xf32> to vector<8x1x256xf32>
    %22 = vector.shape_cast %21 : vector<8x1x256xf32> to vector<8x1x256xf32>
    %23 = vector.broadcast %22 : vector<8x1x256xf32> to vector<8x32x256xf32>
    %24 = vector.shape_cast %23 : vector<8x32x256xf32> to vector<256x256xf32>
    %25 = arith.mulf %14, %19 : vector<256x256xf32>
    %26 = arith.subf %25, %24 : vector<256x256xf32>
    %27 = arith.truncf %26 : vector<256x256xf32> to vector<256x256xbf16>
    %c0_6 = arith.constant 0 : index
    %c0_7 = arith.constant 0 : index
    %28 = vector.load %arg9[%c0_6, %c0_7] : memref<16x256xf32, #tpu.memory_space<vmem>>, vector<16x256xf32>
    %c0_8 = arith.constant 0 : index
    %c0_9 = arith.constant 0 : index
    %29 = vector.load %arg3[%c0_8, %c0_9] : memref<16x256xbf16, #tpu.memory_space<vmem>>, vector<16x256xbf16>
    %cst = arith.constant dense<0.000000e+00> : vector<16x256xf32>
    %30 = tpu.matmul %29, %27, %cst {dimension_numbers = #tpu.dot_dimension_numbers<[1], [0], [0], [1], [0, 0, 1, 1], [], []>} : vector<16x256xbf16>, vector<256x256xbf16>, vector<16x256xf32> -> vector<16x256xf32>
    %31 = arith.addf %28, %30 : vector<16x256xf32>
    %c0_10 = arith.constant 0 : index
    %c0_11 = arith.constant 0 : index
    %32 = vector.load %arg9[%c0_10, %c0_11] : memref<16x256xf32, #tpu.memory_space<vmem>>, vector<16x256xf32>
    tpu.vector_store %arg9[%c0_10, %c0_11], %31 {strides = array<i32>} : memref<16x256xf32, #tpu.memory_space<vmem>>, vector<16x256xf32>,
    %c1_i32 = arith.constant 1 : i32
    %33 = arith.cmpi eq, %arg2, %c1_i32 : i32
    %34 = arith.extui %33 : i1 to i32
    %c0_i32_12 = arith.constant 0 : i32
    %35 = arith.cmpi ne, %34, %c0_i32_12 : i32
    scf.if %35 {
      %c0_13 = arith.constant 0 : index
      %c0_14 = arith.constant 0 : index
      %36 = vector.load %arg9[%c0_13, %c0_14] : memref<16x256xf32, #tpu.memory_space<vmem>>, vector<16x256xf32>
      %c0_15 = arith.constant 0 : index
      %c0_16 = arith.constant 0 : index
      %37 = vector.load %arg7[%c0_15, %c0_16] : memref<1x256xf32, #tpu.memory_space<vmem>>, vector<1x256xf32>
      %38 = vector.broadcast %37 : vector<1x256xf32> to vector<16x256xf32>
      %39 = arith.addf %36, %38 : vector<16x256xf32>
      %40 = arith.truncf %39 : vector<16x256xf32> to vector<16x256xbf16>
      %c0_17 = arith.constant 0 : index
      %c0_18 = arith.constant 0 : index
      %41 = vector.load %arg8[%c0_17, %c0_18] : memref<16x256xbf16, #tpu.memory_space<vmem>>, vector<16x256xbf16>
      tpu.vector_store %arg8[%c0_17, %c0_18], %40 {strides = array<i32>} : memref<16x256xbf16, #tpu.memory_space<vmem>>, vector<16x256xbf16>,
    } else {
    }
    return
  }
  func.func @transform_0(%arg0: i32, %arg1: i32, %arg2: i32) -> (i32, i32) {
    %c0_i32 = arith.constant 0 : i32
    return %arg0, %arg2 : i32, i32
  }
  func.func @transform_1(%arg0: i32, %arg1: i32, %arg2: i32) -> (i32, i32) {
    %c0_i32 = arith.constant 0 : i32
    return %arg2, %arg1 : i32, i32
  }
  func.func @transform_2(%arg0: i32, %arg1: i32, %arg2: i32) -> (i32, i32) {
    %c0_i32 = arith.constant 0 : i32
    return %arg2, %arg1 : i32, i32
  }
  func.func @transform_3(%arg0: i32, %arg1: i32, %arg2: i32) -> (i32, i32) {
    %c0_i32 = arith.constant 0 : i32
    return %arg2, %arg1 : i32, i32
  }
  func.func @transform_4(%arg0: i32, %arg1: i32, %arg2: i32) -> (i32, i32) {
    %c0_i32 = arith.constant 0 : i32
    %c0_i32_0 = arith.constant 0 : i32
    return %c0_i32, %arg1 : i32, i32
  }
  func.func @transform_5(%arg0: i32, %arg1: i32, %arg2: i32) -> (i32, i32) {
    %c0_i32 = arith.constant 0 : i32
    return %arg0, %arg1 : i32, i32
  }
}

</mosaic_0001>

<bundles_post_ra>
// kernel: tpu_custom_call.1
= control target key start
LH: loop header
LB: loop body
LE: loop exit
PB: predicated region body
PF: predicated region fallthrough
CT: control target
= control target key end

     0   :  { %s2869_s0 = inlined_call_operand.hbm [shape: bf16[16,512], index: 0, kind: input, shape index: {}]   ;;  %s2870_s1 = inlined_call_operand.hbm [shape: s32[64,256], index: 1, kind: input, shape index: {}]   ;;  %s2871_s2 = inlined_call_operand.hbm [shape: f32[16,256], index: 2, kind: input, shape index: {}]   ;;  %s2872_s3 = inlined_call_operand.hbm [shape: f32[16,256], index: 3, kind: input, shape index: {}]   ;;  %s2873_s4 = inlined_call_operand.vmem [shape: f32[1,256], index: 4, kind: input, shape index: {}]   ;;  %s2874_s5 = inlined_call_operand.hbm [shape: bf16[16,256], index: 5, kind: output, shape index: {}]  }
   0x1   :  { %2883 = sst [smem:[#allocation20_spill]] %s2869_s0 }
   0x2   :  { %2884 = sst [smem:[#allocation21_spill]] %s2870_s1 }
   0x3   :  { %2885 = sst [smem:[#allocation22_spill]] %s2874_s5 }
   0x4   :  { %10 = vsyncpa [#allocation4], 0 }
   0x5   :  { %12 = vsyncpa [#allocation4 + $0x1], 0 }
   0x6   :  { %13 = vsyncpa [#allocation7], 0 }
   0x7   :  { %15 = vsyncpa [#allocation7 + $0x1], 0 }
   0x8   :  { %16 = vsyncpa [#allocation10], 0 }
   0x9   :  { %18 = vsyncpa [#allocation10 + $0x1], 0 }
   0xa   :  { %19 = vsyncpa [#allocation5], 0  ;;  %s2185_s18 = smov 0   ;;  %s2187_s19 = smov 0  }
   0xb   :  { %s2189_s20 = smov 0   ;;  %s2191_s21 = smov 0  }
   0xc   :  { %s2193_s22 = smov 0   ;;  %s2195_s23 = smov 0  }
   0xd LB: > { %2886 = sst [smem:[#allocation16_spill]] %s2128_s20  ;;  %s2214_s24 = sadd.s32 4294967295, %s2140_s23   ;;  %s2140_s23 = sphi %s2195_s23, %s25_s23   ;;  %s2136_s22 = sphi %s2193_s22, %s2912_s22   ;;  %s2132_s21 = sphi %s2191_s21, %s2911_s21   ;;  %s2128_s20 = sphi %s2189_s20, %s2910_s20   ;;  %s2124_s19 = sphi %s2187_s19, %s2909_s19   ;;  %s2120_s18 = sphi %s2185_s18, %s2908_s18  }
   0xe   : > { %2887 = sst [smem:[#allocation17_spill]] %s2140_s23  ;;  %s37_s25 = sadd.s32 1, %s2136_s22 }
   0xf   : > { %p38_p0 = scmp.ge.s32.totalorder %s37_s25, 2  ;;  %s53_s26 = sadd.s32 1, %s2128_s20 }
  0x10   : > { %p60_p1 = scmp.ne.s32.totalorder %s2128_s20, %s2124_s19  ;;  %p61_p2 = scmp.eq.s32.totalorder %s2140_s23, 0 }
  0x11   : > { %s2914_s25 = smov (%p38_p0, %s37_s25), 0  ;;  %p66_p4 = scmp.ne.s32.totalorder %s2124_s19, %s2120_s18 }
  0x12   : > { %2888 = sst [smem:[#allocation18_spill]] %s2914_s25  ;;  %p62_p3 = por %p61_p2, %p60_p1 }
  0x13   : > { %s49_s27 = ssub.s32 %s2136_s22, %s2914_s25  ;;  %p67_p5 = scmp.eq.s32.totalorder %s2214_s24, 0 }
  0x14   : > { %p51_p6 = scmp.eq.s32.totalorder %s49_s27, 0  ;;  %p1851_p8 = scmp.lt.s32.totalorder %s2140_s23, 2 }
  0x15   : > { %p2227_p7 = por %p67_p5, %p66_p4  ;;  %s2236_s30 = sand.u32 1, %s2128_s20  }
  0x16   : > { %s2233_s29 = scalar_select %p51_p6, %s2128_s20, %s53_s26  }
  0x17   : > { %s2889_s28 = scalar_select %p2227_p7, 1, 0 }
  0x18   : > { %2890 = sst [smem:[#allocation19_spill]] %s2233_s29  ;;  %p2238_p9 = pnand %p1851_p8, %p62_p3 }
  0x19   : > { %s260_s7 = sand.u32 1, %s2140_s23   ;;  %s1794_s8 = sshll.u32 %s2236_s30, 6 }
  0x1a   : > { %s2891_s6 = scalar_select %p2238_p9, 1, 0 }
  0x1b   : > { %s1821_s9 = sshll.u32 %s2136_s22, 10  ;;  %s2892_s1 = sld [smem:[#allocation21_spill]] }
  0x1c   : > { %s264_s13 = scalar_lea.vmem [#allocation6], %s1794_s8  ;;  %s2253_s15 = scalar_lea.sflag [#allocation7], %s260_s7 }
  0x1d   : > { %s274_s14 = sshll.u32 %s264_s13, 4  ;;  %p2259_p12 = pneg %p2238_p9  ;;  %s2250_s14 = int_to_ptr.vmem [resolvable:$true] %s274_s14 }
  0x21   : > { %s2248_s12 = scalar_lea.hbm %s2892_s1, %s1821_s9  ;;  %s1937_s27 = scalar_lea.hbm %s2892_s1, 2048 }
  0x22   : > { %s1932_s16 = scalar_lea.hbm %s2248_s12, 1024  ;;  %p1938_p1 = scmp.lt.u32.totalorder %s2248_s12, %s2892_s1 }
  0x23   : > { %p1933_p11 = scmp.ne.s32.totalorder %s2248_s12, %s1932_s16  ;;  %p1939_p2 = scmp.lt.u32.totalorder %s1937_s27, %s1932_s16 }
  0x24   : > { %p1941_p4 = scmp.lt.u32.totalorder %s1932_s16, %s2248_s12 }
  0x25   : > { %p1935_p13 = pnand %p2259_p12, %p1933_p11  ;;  %p1940_p3 = por %p1939_p2, %p1938_p1 }
  0x27   : > { %p1936_p0 = pneg %p1935_p13  ;;  %p1942_p5 = por %p1941_p4, %p1940_p3 }
  0x29   : > { %p1943_p6 = pnand %p1942_p5, %p1936_p0 }
  0x2b   : > { %1946 = shalt.err (!%p1943_p6)
}
  0x2c   : > { %s1947_s7 = scalar_lea.vmem %s2250_s14, 1024  ;;  %s2142_s10 = smov [#allocation6]  }
  0x2d   : > { %p1948_p8 = scmp.ne.s32.totalorder %s2250_s14, %s1947_s7  ;;  %s1952_s11 = sshll.u32 %s2142_s10, 4  ;;  %s1953_s11 = int_to_ptr.vmem [resolvable:$false] %s1952_s11 }
  0x2e   : > { %s1954_s13 = scalar_lea.vmem %s1953_s11, 2048  ;;  %p1955_p10 = scmp.lt.s32.totalorder %s2250_s14, %s1953_s11 }
  0x2f   : > { %p1950_p11 = pnand %p1948_p8, %p2259_p12  ;;  %p1956_p7 = scmp.lt.s32.totalorder %s1954_s13, %s1947_s7 }
  0x31   : > { %p1951_p13 = pneg %p1950_p11  ;;  %p1957_p1 = por %p1956_p7, %p1955_p10 }
  0x33   : > { %p1958_p2 = pnand %p1957_p1, %p1951_p13 }
  0x35   : > { %1961 = shalt.err (!%p1958_p2)
}
  0x36   : > { %s2876_s16 = smov 256   ;;  %s2144_s18 = smov 16  }
  0x37   : > { %1844 = dma.hbm_to_vmem [thread:$0]  (!%p2238_p9), %s2248_s12, 1024, %s2250_s14, %s2253_s15, %s2876_s16, %s2876_s16, %s2144_s18  }
  0x38   : > { %p324_p0 = scmp.lt.s32.totalorder %s2140_s23, 3  ;;  %p2894_p7 = scmp.ge.s32.totalorder %s2140_s23, 1 }
  0x39   : > { %s2293_s27 = sshll.u32 %s2236_s30, 4  ;;  %s1819_s8 = sshll.u32 %s2136_s22, 7 }
  0x3a   : > { %p2288_p10 = pnand %p2894_p7, %p324_p0  ;;  %s2896_s0 = sld [smem:[#allocation20_spill]] }
  0x3b   : > { %s240_s12 = scalar_lea.vmem [#allocation3], %s2293_s27  ;;  %s237_s11 = scalar_lea.sflag [#allocation4], %s2236_s30 }
  0x3c   : > { %s2895_s26 = scalar_select %p2288_p10, 1, 0 }
  0x3d   : > { %s250_s14 = sshll.u32 %s240_s12, 4  ;;  %s2302_s14 = int_to_ptr.vmem [resolvable:$true] %s250_s14 }
  0x40   : > { %s2299_s10 = scalar_lea.hbm %s2896_s0, %s1819_s8  ;;  %s1967_s9 = scalar_lea.hbm %s2896_s0, 512 }
  0x41   : > { %s1962_s13 = scalar_lea.hbm %s2299_s10, 256  ;;  %p1968_p6 = scmp.lt.u32.totalorder %s2299_s10, %s2896_s0 }
  0x42   : > { %p1963_p3 = scmp.ne.s32.totalorder %s2299_s10, %s1962_s13  ;;  %p1969_p8 = scmp.lt.u32.totalorder %s1967_s9, %s1962_s13 }
  0x43   : > { %p1971_p13 = scmp.lt.u32.totalorder %s1962_s13, %s2299_s10 }
  0x44   : > { %p1965_p4 = pnand %p1963_p3, %p2259_p12  ;;  %p1970_p11 = por %p1969_p8, %p1968_p6 }
  0x46   : > { %p1966_p5 = pneg %p1965_p4  ;;  %p1972_p1 = por %p1971_p13, %p1970_p11 }
  0x48   : > { %p1973_p2 = pnand %p1972_p1, %p1966_p5 }
  0x4a   : > { %1976 = shalt.err (!%p1973_p2)
}
  0x4b   : > { %s1977_s12 = scalar_lea.vmem %s2302_s14, 256  ;;  %s2145_s16 = smov [#allocation3]  }
  0x4c   : > { %p1978_p0 = scmp.ne.s32.totalorder %s2302_s14, %s1977_s12  ;;  %s1982_s18 = sshll.u32 %s2145_s16, 4  ;;  %s1983_s18 = int_to_ptr.vmem [resolvable:$false] %s1982_s18 }
  0x4d   : > { %s1984_s8 = scalar_lea.vmem %s1983_s18, 512  ;;  %p1985_p4 = scmp.lt.s32.totalorder %s2302_s14, %s1983_s18 }
  0x4e   : > { %p1980_p7 = pnand %p1978_p0, %p2259_p12  ;;  %p1986_p10 = scmp.lt.s32.totalorder %s1984_s8, %s1977_s12 }
  0x50   : > { %p1981_p3 = pneg %p1980_p7  ;;  %p1987_p6 = por %p1986_p10, %p1985_p4 }
  0x52   : > { %p1988_p8 = pnand %p1987_p6, %p1981_p3 }
  0x54   : > { %1991 = shalt.err (!%p1988_p8)
}
  0x55   : > { %s2146_s13 = smov 128   ;;  %s2147_s9 = smov 8  }
  0x56   : > { %s2897_s7 = smov 256   ;;  %s1822_s16 = sshll.u32 %s2136_s22, 8 }
  0x57   : > { %1841 = dma.hbm_to_vmem [thread:$0]  (!%p2238_p9), %s2299_s10, 256, %s2302_s14, %s237_s11, %s2897_s7, %s2146_s13, %s2147_s9  }
  0x58   : > { %s288_s18 = scalar_lea.vmem [#allocation8], %s2293_s27  ;;  %s296_s1 = scalar_lea.hbm %s2871_s2, %s1822_s16 }
  0x59   : > { %s298_s12 = sshll.u32 %s288_s18, 4  ;;  %s1992_s25 = scalar_lea.hbm %s296_s1, 256  ;;  %s299_s12 = int_to_ptr.vmem [resolvable:$true] %s298_s12 }
  0x5a   : > { %p1993_p10 = scmp.ne.s32.totalorder %s296_s1, %s1992_s25  ;;  %s1997_s23 = scalar_lea.hbm %s2871_s2, 512 }
  0x5b   : > { %p1998_p13 = scmp.lt.u32.totalorder %s296_s1, %s2871_s2  ;;  %p1999_p1 = scmp.lt.u32.totalorder %s1997_s23, %s1992_s25 }
  0x5c   : > { %p1995_p5 = pnand %p1993_p10, %p2259_p12  ;;  %p2001_p0 = scmp.lt.u32.totalorder %s1992_s25, %s296_s1 }
  0x5d   : > { %p2000_p2 = por %p1999_p1, %p1998_p13 }
  0x5e   : > { %p1996_p11 = pneg %p1995_p5 }
  0x5f   : > { %p2002_p7 = por %p2001_p0, %p2000_p2 }
  0x61   : > { %p2003_p3 = pnand %p2002_p7, %p1996_p11 }
  0x63   : > { %2006 = shalt.err (!%p2003_p3)
}
  0x64   : > { %s2007_s0 = scalar_lea.vmem %s299_s12, 256  ;;  %s2148_s14 = smov [#allocation8]  }
  0x65   : > { %p2008_p4 = scmp.ne.s32.totalorder %s299_s12, %s2007_s0  ;;  %s2012_s11 = sshll.u32 %s2148_s14, 4  ;;  %s2013_s11 = int_to_ptr.vmem [resolvable:$false] %s2012_s11 }
  0x66   : > { %s2014_s20 = scalar_lea.vmem %s2013_s11, 512  ;;  %p2015_p10 = scmp.lt.s32.totalorder %s299_s12, %s2013_s11 }
  0x67   : > { %p2010_p6 = pnand %p2008_p4, %p2259_p12  ;;  %p2016_p5 = scmp.lt.s32.totalorder %s2014_s20, %s2007_s0 }
  0x69   : > { %p2011_p8 = pneg %p2010_p6  ;;  %p2017_p9 = por %p2016_p5, %p2015_p10 }
  0x6b   : > { %p2018_p1 = pnand %p2017_p9, %p2011_p8 }
  0x6d   : > { %2021 = shalt.err (!%p2018_p1)
}
  0x6e   : > { %p2898_p13 = scmp.ne.s32.totalorder %s2891_s6, 0  ;;  %s2354_s25 = scalar_lea.hbm %s2872_s3, %s1822_s16 }
  0x6f   : > { %s309_s29 = scalar_lea.vmem [#allocation9], %s2293_s27  ;;  %s306_s9 = scalar_lea.sflag [#allocation10], %s2236_s30 }
  0x70   : > { %1847 = dma.hbm_to_vmem [thread:$0]  (!%p2898_p13), %s296_s1, 256, %s299_s12, %s2253_s15  }
  0x71   : > { %s319_s13 = sshll.u32 %s309_s29, 4  ;;  %s2022_s7 = scalar_lea.hbm %s2354_s25, 256  ;;  %s320_s13 = int_to_ptr.vmem [resolvable:$true] %s319_s13 }
  0x72   : > { %p2023_p9 = scmp.ne.s32.totalorder %s2354_s25, %s2022_s7  ;;  %s2027_s18 = scalar_lea.hbm %s2872_s3, 512 }
  0x73   : > { %p2028_p0 = scmp.lt.u32.totalorder %s2354_s25, %s2872_s3  ;;  %p2029_p7 = scmp.lt.u32.totalorder %s2027_s18, %s2022_s7 }
  0x74   : > { %p2025_p11 = pnand %p2023_p9, %p2259_p12  ;;  %p2031_p4 = scmp.lt.u32.totalorder %s2022_s7, %s2354_s25 }
  0x75   : > { %p2030_p3 = por %p2029_p7, %p2028_p0 }
  0x76   : > { %p2026_p2 = pneg %p2025_p11 }
  0x77   : > { %p2032_p6 = por %p2031_p4, %p2030_p3 }
  0x79   : > { %p2033_p8 = pnand %p2032_p6, %p2026_p2 }
  0x7b   : > { %2036 = shalt.err (!%p2033_p8)
}
  0x7c   : > { %s2037_s30 = scalar_lea.vmem %s320_s13, 256  ;;  %s2149_s27 = smov [#allocation9]  }
  0x7d   : > { %p2038_p10 = scmp.ne.s32.totalorder %s320_s13, %s2037_s30  ;;  %s2042_s8 = sshll.u32 %s2149_s27, 4  ;;  %s2043_s8 = int_to_ptr.vmem [resolvable:$false] %s2042_s8 }
  0x7e   : > { %s2044_s10 = scalar_lea.vmem %s2043_s8, 512  ;;  %p2045_p9 = scmp.lt.s32.totalorder %s320_s13, %s2043_s8 }
  0x7f   : > { %p2040_p5 = pnand %p2038_p10, %p2259_p12  ;;  %p2046_p11 = scmp.lt.s32.totalorder %s2044_s10, %s2037_s30 }
  0x81   : > { %p2041_p1 = pneg %p2040_p5  ;;  %p2047_p13 = por %p2046_p11, %p2045_p9 }
  0x83   : > { %p2048_p0 = pnand %p2047_p13, %p2041_p1 }
  0x85   : > { %2051 = shalt.err (!%p2048_p0)
}
  0x86   : > { %p2899_p7 = scmp.ne.s32.totalorder %s2891_s6, 0  ;;  %p2900_p2 = scmp.ne.s32.totalorder %s2895_s26, 0 }
  0x87   : > { %s330_s17 = sand.u32 (!%p2900_p2), 1, %s2124_s19   ;;  %p2901_p12 = scmp.ne.s32.totalorder (!%p2900_p2), %s2889_s28, 0 }
  0x88   : > { %1850 = dma.hbm_to_vmem [thread:$0]  (!%p2899_p7), %s2354_s25, 256, %s320_s13, %s306_s9  }
  0x89   : > { %328 = sbr.rel (%p2900_p2) target bundleno = 569 (0x239), region = 40  ;;  %s2378_s0 = sshll.u32 (!%p2900_p2), %s330_s17, 4 }
  0x8a   : > { %s331_s14 = scalar_lea.sflag (!%p2900_p2), [#allocation4], %s330_s17  ;;  %s334_s11 = scalar_lea.vmem (!%p2900_p2), [#allocation3], %s2378_s0 }
  0x90   : > { %2103 = dma.done.wait (%p2901_p12), %s331_s14, 256  }
  0x91   : > { %2105 = vsyncadd (%p2901_p12), %s331_s14, 4294967040  ;;  %s339_s6 = sand.u32 1, %s2214_s24   ;;  %s1806_s20 = sshll.u32 %s330_s17, 6 }
  0x92   : > { %s340_s5 = scalar_lea.sflag [#allocation7], %s339_s6  ;;  %s2386_s26 = scalar_lea.vmem [#allocation6], %s1806_s20 }
  0x93   : > { %2107 = dma.done.wait (%p2901_p12), %s340_s5, 1280  }
  0x94   : > { %2109 = vsyncadd (%p2901_p12), %s340_s5, 4294966016  ;;  %s352_s23 = scalar_lea.vmem [#allocation8], %s2378_s0  ;;  %s358_s25 = scalar_lea.sflag [#allocation10], %s330_s17 }
  0x95   : > { %s361_s29 = scalar_lea.vmem [#allocation9], %s2378_s0 }
  0x96   : > { %2111 = dma.done.wait (%p2901_p12), %s358_s25, 256  }
  0x97   : > { %2113 = vsyncadd (%p2901_p12), %s358_s25, 4294967040  ;;  %p1809_p13 = scmp.ne.s32.totalorder %s2132_s21, 0 }
  0x98   : > { %v2150_v0 = vmov (!%p1809_p13), 0.0  }
  0x99   : > { %418 = sbr.rel (%p1809_p13) target bundleno = 160 (0xa0), region = 60  ;;  %419 = vst [vmem:[#allocation2] sm:$0xff] (!%p1809_p13), %v2150_v0  ;;  %420 = vst [vmem:[#allocation2 + $0x8] sm:$0xff] (!%p1809_p13), %v2150_v0 }
  0x9a   : > { %421 = vst [vmem:[#allocation2 + $0x10] sm:$0xff] (!%p1809_p13), %v2150_v0  ;;  %422 = vst [vmem:[#allocation2 + $0x18] sm:$0xff] (!%p1809_p13), %v2150_v0 }
  0xa0 PF: > { %v431_v1 = vlaneseq  ;;  %v1911_v2 = vld [vmem:[%s2386_s26] ss:$8 sps:$4 sm:$0xff]   ;;  %v2151_v3 = vmov 1966171168   ;;  %v1913_v6 = vld [vmem:[%s2386_s26 + $0x4] ss:$8 sps:$4 sm:$0xff]  }
  0xa1   : > { %v437_v4 = vunpack.c.l.s4 %v2151_v3  ;;  %v1914_v7 = vld [vmem:[%s352_s23] ss:$8 sps:$4 sm:$0xff]   ;;  %v1916_v9 = vld [vmem:[%s352_s23 + $0x4] ss:$8 sps:$4 sm:$0xff]   ;;  %p1812_p3 = scmp.ne.s32.totalorder %s2132_s21, 1 }
  0xa2   : > { %v432_v5 = vshrl.u32 %v431_v1, 7  ;;  %v1917_v10 = vld [vmem:[%s361_s29] ss:$8 sps:$4 sm:$0xff]   ;;  %v1922_v13 = vld [vmem:[%s2386_s26 + $0x14] ss:$8 sps:$4 sm:$0xff]  }
  0xa3   : > { %v438_v8 = vunpack.c.0.s8 %v437_v4  ;;  %v1920_v12 = vld [vmem:[%s2386_s26 + $0x10] ss:$8 sps:$4 sm:$0xff]   ;;  %v1923_v17 = vld [vmem:[%s2386_s26 + $0x20] ss:$8 sps:$4 sm:$0xff]   ;;  %v1931_v58 = vld [vmem:[%s334_s11 + $0x4] ss:$8 sps:$4 sm:$0xff]  }
  0xa4   : > { %v2407_v14 = vmul.u32 4, %v432_v5  ;;  %v2409_v15 = vsub.s32 0, %v432_v5  ;;  %v2411_v16 = vsub.s32 1, %v432_v5  ;;  %1558 = vmatprep.mubr.bf16.mxu0 %v1931_v58 }
  0xa5   : > { %v2403_v11 = vsub.s32 %v438_v8, %v432_v5 }
  0xa7   : > { %v442_v18 = vrot.slane %v1911_v2, %v2403_v11  ;;  %v2416_v19 = vrot.slane %v1914_v7, %v2403_v11  ;;  %v2419_v20 = vrot.slane %v1917_v10, %v2403_v11  ;;  %v449_v21 = vrot.slane %v1913_v6, %v2403_v11 }
  0xa8   : > { %v2423_v22 = vrot.slane %v1920_v12, %v2403_v11  ;;  %v2426_v23 = vrot.slane %v1922_v13, %v2403_v11  ;;  %v2429_v24 = vrot.slane %v1923_v17, %v2403_v11  ;;  %v2432_v25 = vrot.slane %v1916_v9, %v2403_v11 }
  0xa9   : > { %v450_v26 = vcombine.high %v442_v18, %v442_v18  ;;  %v458_v27 = vrot.slane %v442_v18, %v2403_v11  ;;  %v1102_v28 = vcombine.high %v2416_v19, %v2416_v19  ;;  %v2439_v29 = vrot.slane %v2416_v19, %v2403_v11 }
  0xaa   : > { %v1236_v30 = vcombine.high %v2419_v20, %v2419_v20  ;;  %v2445_v31 = vrot.slane %v2419_v20, %v2403_v11  ;;  %v451_v32 = vcombine.high %v449_v21, %v449_v21  ;;  %v2448_v33 = vrot.slane %v449_v21, %v2403_v11 }
  0xab   : > { %v472_v34 = vrot.slane %v450_v26, %v2403_v11  ;;  %v641_v35 = vrot.slane %v458_v27, %v2411_v16  ;;  %v1143_v36 = vrot.slane %v2439_v29, %v2411_v16  ;;  %v637_v37 = vrot.slane %v458_v27, %v2409_v15 }
  0xac   : > { %v2457_v38 = vrot.slane %v2445_v31, %v2411_v16  ;;  %v1139_v39 = vrot.slane %v2439_v29, %v2409_v15  ;;  %v2463_v40 = vrot.slane %v2445_v31, %v2409_v15  ;;  %v480_v41 = vcombine.high %v458_v27, %v458_v27 }
  0xad   : > { %v649_v42 = vrot.slane %v472_v34, %v2411_v16  ;;  %v891_v43 = vshra.s32 %v641_v35, %v2407_v14  ;;  %v645_v44 = vrot.slane %v472_v34, %v2409_v15  ;;  %v890_v45 = vshra.s32 %v637_v37, %v2407_v14 }
  0xae   : > { %v482_v46 = vcombine.high %v472_v34, %v472_v34  ;;  %v657_v47 = vrot.slane %v480_v41, %v2411_v16  ;;  %v653_v48 = vrot.slane %v480_v41, %v2409_v15  ;;  %v2472_v49 = vrot.slane %v451_v32, %v2403_v11 }
  0xaf   : > { %v893_v50 = vshra.s32 %v649_v42, %v2407_v14  ;;  %v955_v51 = vand.u32 15, %v891_v43  ;;  %v892_v52 = vshra.s32 %v645_v44, %v2407_v14  ;;  %v954_v53 = vand.u32 15, %v890_v45 }
  0xb0   : > { %v665_v54 = vrot.slane %v482_v46, %v2411_v16  ;;  %v895_v55 = vshra.s32 %v657_v47, %v2407_v14  ;;  %v661_v56 = vrot.slane %v482_v46, %v2409_v15  ;;  %v894_v57 = vshra.s32 %v653_v48, %v2407_v14 }
  0xb1   : > { %v957_v59 = vand.u32 15, %v893_v50  ;;  %v1019_v60 = vcvt.s32.f32 %v955_v51  ;;  %v956_v61 = vand.u32 15, %v892_v52  ;;  %v1018_v62 = vcvt.s32.f32 %v954_v53 }
  0xb2   : > { %v897_v63 = vshra.s32 %v665_v54, %v2407_v14  ;;  %v959_v0 = vand.u32 15, %v895_v55  ;;  %v896_v1 = vshra.s32 %v661_v56, %v2407_v14  ;;  %v958_v2 = vand.u32 15, %v894_v57 }
  0xb3   : > { %v1021_v3 = vcvt.s32.f32 %v957_v59  ;;  %v1351_v4 = vmul.f32 %v1143_v36, %v1019_v60  ;;  %v1020_v5 = vcvt.s32.f32 %v956_v61  ;;  %v1350_v6 = vmul.f32 %v1139_v39, %v1018_v62 }
  0xb4   : > { %v961_v7 = vand.u32 15, %v897_v63  ;;  %v1023_v8 = vcvt.s32.f32 %v959_v0  ;;  %v960_v9 = vand.u32 15, %v896_v1  ;;  %v1022_v10 = vcvt.s32.f32 %v958_v2 }
  0xb5   : > { %v1353_v12 = vmul.f32 %v1143_v36, %v1021_v3  ;;  %v1415_v13 = vsub.f32 %v1351_v4, %v2457_v38  ;;  %v1352_v17 = vmul.f32 %v1139_v39, %v1020_v5  ;;  %v1414_v18 = vsub.f32 %v1350_v6, %v2463_v40 }
  0xb6   : > { %v1025_v21 = vcvt.s32.f32 %v961_v7  ;;  %v1355_v26 = vmul.f32 %v1143_v36, %v1023_v8  ;;  %v1024_v27 = vcvt.s32.f32 %v960_v9  ;;  %v1354_v32 = vmul.f32 %v1139_v39, %v1022_v10 }
  0xb7   : > { %v1417_v34 = vsub.f32 %v1353_v12, %v2457_v38  ;;  %v1416_v35 = vsub.f32 %v1352_v17, %v2463_v40  ;;  %v673_v37 = vrot.slane %v2448_v33, %v2411_v16  ;;  %v681_v41 = vrot.slane %v2472_v49, %v2411_v16 }
  0xb8   : > { %v1357_v42 = vmul.f32 %v1143_v36, %v1025_v21  ;;  %v1419_v43 = vsub.f32 %v1355_v26, %v2457_v38  ;;  %v1356_v44 = vmul.f32 %v1139_v39, %v1024_v27  ;;  %v1418_v45 = vsub.f32 %v1354_v32, %v2463_v40 }
  0xb9   : > { %v1479_v46 = vpack.c.bf16 %v1417_v34, %v1415_v13  ;;  %v1478_v47 = vpack.c.bf16 %v1416_v35, %v1414_v18  ;;  %v899_v48 = vshra.s32 %v673_v37, %v2407_v14  ;;  %v901_v50 = vshra.s32 %v681_v41, %v2407_v14 }
  0xba   : > { %v1421_v51 = vsub.f32 %v1357_v42, %v2457_v38  ;;  %v1420_v52 = vsub.f32 %v1356_v44, %v2463_v40  ;;  %v2502_v36 = vrot.slane %v1102_v28, %v2403_v11  ;;  %v2508_v39 = vrot.slane %v1236_v30, %v2403_v11 }
  0xbb   : > { %1526 = vmatprep.subr.bf16.mxu0 %v1479_v46  ;;  %v963_v53 = vand.u32 15, %v899_v48  ;;  %v965_v54 = vand.u32 15, %v901_v50  ;;  %v669_v38 = vrot.slane %v2448_v33, %v2409_v15  ;;  %v677_v40 = vrot.slane %v2472_v49, %v2409_v15 }
  0xbc   : > { %1527 = vmatpush1.bf16.msra.mxu0 %v1478_v47  ;;  %v1481_v55 = vpack.c.bf16 %v1421_v51, %v1419_v43  ;;  %v1480_v19 = vpack.c.bf16 %v1420_v52, %v1418_v45  ;;  %v1151_v28 = vrot.slane %v2502_v36, %v2411_v16  ;;  %v2518_v20 = vrot.slane %v2508_v39, %v2411_v16 }
  0xbd   : > { %v1027_v30 = vcvt.s32.f32 %v963_v53  ;;  %v1029_v56 = vcvt.s32.f32 %v965_v54  ;;  %v898_v57 = vshra.s32 %v669_v38, %v2407_v14  ;;  %v900_v58 = vshra.s32 %v677_v40, %v2407_v14 }
  0xbe   : > { %1528 = vmatprep.subr.bf16.mxu0 %v1481_v55  ;;  %v1147_v59 = vrot.slane %v2502_v36, %v2409_v15  ;;  %v1281_v60 = vrot.slane %v2508_v39, %v2409_v15  ;;  %v481_v61 = vcombine.high %v2448_v33, %v2448_v33  ;;  %v483_v62 = vcombine.high %v2472_v49, %v2472_v49 }
  0xbf   : > { %v1359_v63 = vmul.f32 %v1151_v28, %v1027_v30  ;;  %v1361_v0 = vmul.f32 %v1151_v28, %v1029_v56  ;;  %v962_v1 = vand.u32 15, %v898_v57  ;;  %v964_v2 = vand.u32 15, %v900_v58 }
  0xc0   : > { %1529 = vmatpush1.bf16.msra.mxu0 %v1480_v19  ;;  %v689_v3 = vrot.slane %v481_v61, %v2411_v16  ;;  %v697_v4 = vrot.slane %v483_v62, %v2411_v16  ;;  %v685_v5 = vrot.slane %v481_v61, %v2409_v15  ;;  %v693_v6 = vrot.slane %v483_v62, %v2409_v15 }
  0xc1   : > { %v1423_v7 = vsub.f32 %v1359_v63, %v2518_v20  ;;  %v1425_v33 = vsub.f32 %v1361_v0, %v2518_v20  ;;  %v1026_v8 = vcvt.s32.f32 %v962_v1  ;;  %v1028_v9 = vcvt.s32.f32 %v964_v2 }
  0xc2   : > { %v903_v49 = vshra.s32 %v689_v3, %v2407_v14  ;;  %v905_v10 = vshra.s32 %v697_v4, %v2407_v14  ;;  %v902_v12 = vshra.s32 %v685_v5, %v2407_v14  ;;  %v904_v13 = vshra.s32 %v693_v6, %v2407_v14 }
  0xc3   : > { %v1483_v17 = vpack.c.bf16 %v1425_v33, %v1423_v7  ;;  %v1358_v18 = vmul.f32 %v1147_v59, %v1026_v8  ;;  %v1360_v21 = vmul.f32 %v1147_v59, %v1028_v9  ;;  %v500_v26 = vcombine.high %v2423_v22, %v2423_v22 }
  0xc4   : > { %v967_v27 = vand.u32 15, %v903_v49  ;;  %v969_v32 = vand.u32 15, %v905_v10  ;;  %v966_v34 = vand.u32 15, %v902_v12  ;;  %v968_v35 = vand.u32 15, %v904_v13 }
  0xc5   : > { %1530 = vmatprep.subr.bf16.mxu0 %v1483_v17  ;;  %v1422_v37 = vsub.f32 %v1358_v18, %v1281_v60  ;;  %v1424_v41 = vsub.f32 %v1360_v21, %v1281_v60  ;;  %v508_v42 = vrot.slane %v2423_v22, %v2403_v11  ;;  %v522_v43 = vrot.slane %v500_v26, %v2403_v11 }
  0xc6   : > { %v1031_v44 = vcvt.s32.f32 %v967_v27  ;;  %v1033_v45 = vcvt.s32.f32 %v969_v32  ;;  %v1030_v46 = vcvt.s32.f32 %v966_v34  ;;  %v1032_v47 = vcvt.s32.f32 %v968_v35 }
  0xc7   : > { %v1482_v48 = vpack.c.bf16 %v1424_v41, %v1422_v37  ;;  %v705_v50 = vrot.slane %v508_v42, %v2411_v16  ;;  %v713_v51 = vrot.slane %v522_v43, %v2411_v16  ;;  %v1132_v52 = vcombine.high %v2439_v29, %v2439_v29 }
  0xc8   : > { %v1363_v53 = vmul.f32 %v1151_v28, %v1031_v44  ;;  %v1365_v54 = vmul.f32 %v1151_v28, %v1033_v45  ;;  %v1362_v38 = vmul.f32 %v1147_v59, %v1030_v46  ;;  %v1364_v40 = vmul.f32 %v1147_v59, %v1032_v47 }
  0xc9   : > { %1531 = vmatpush1.bf16.msra.mxu0 %v1482_v48  ;;  %v907_v22 = vshra.s32 %v705_v50, %v2407_v14  ;;  %v909_v55 = vshra.s32 %v713_v51, %v2407_v14  ;;  %v2552_v19 = vrot.slane %v1132_v52, %v2411_v16  ;;  %v1266_v30 = vcombine.high %v2445_v31, %v2445_v31 }
  0xca   : > { %v1427_v56 = vsub.f32 %v1363_v53, %v2518_v20  ;;  %v1429_v57 = vsub.f32 %v1365_v54, %v2518_v20  ;;  %v1426_v29 = vsub.f32 %v1362_v38, %v1281_v60  ;;  %v1428_v58 = vsub.f32 %v1364_v40, %v1281_v60 }
  0xcb   : > { %v971_v28 = vand.u32 15, %v907_v22  ;;  %v973_v61 = vand.u32 15, %v909_v55  ;;  %v2559_v59 = vrot.slane %v1266_v30, %v2411_v16  ;;  %v701_v62 = vrot.slane %v508_v42, %v2409_v15 }
  0xcc   : > { %v1485_v63 = vpack.c.bf16 %v1429_v57, %v1427_v56  ;;  %v1484_v0 = vpack.c.bf16 %v1428_v58, %v1426_v29  ;;  %v709_v1 = vrot.slane %v522_v43, %v2409_v15  ;;  %v1155_v2 = vrot.slane %v1132_v52, %v2409_v15 }
  0xcd   : > { %v1035_v31 = vcvt.s32.f32 %v971_v28  ;;  %v1037_v3 = vcvt.s32.f32 %v973_v61  ;;  %v906_v4 = vshra.s32 %v701_v62, %v2407_v14  ;;  %v2566_v20 = vrot.slane %v1266_v30, %v2409_v15 }
  0xce   : > { %1532 = vmatprep.subr.bf16.mxu0 %v1485_v63  ;;  %v908_v60 = vshra.s32 %v709_v1, %v2407_v14  ;;  %v530_v5 = vcombine.high %v508_v42, %v508_v42  ;;  %v532_v6 = vcombine.high %v522_v43, %v522_v43  ;;  %v501_v7 = vcombine.high %v2426_v23, %v2426_v23 }
  0xcf   : > { %1533 = vmatpush1.bf16.msra.mxu0 %v1484_v0  ;;  %v1367_v33 = vmul.f32 %v2552_v19, %v1035_v31  ;;  %v1369_v8 = vmul.f32 %v2552_v19, %v1037_v3  ;;  %v970_v9 = vand.u32 15, %v906_v4  ;;  %v515_v49 = vrot.slane %v2426_v23, %v2403_v11 }
  0xd0   : > { %v972_v10 = vand.u32 15, %v908_v60  ;;  %v721_v12 = vrot.slane %v530_v5, %v2411_v16  ;;  %v729_v13 = vrot.slane %v532_v6, %v2411_v16  ;;  %v717_v17 = vrot.slane %v530_v5, %v2409_v15 }
  0xd1   : > { %v1431_v18 = vsub.f32 %v1367_v33, %v2559_v59  ;;  %v1433_v21 = vsub.f32 %v1369_v8, %v2559_v59  ;;  %v1034_v26 = vcvt.s32.f32 %v970_v9  ;;  %v725_v27 = vrot.slane %v532_v6, %v2409_v15 }
  0xd2   : > { %v1036_v32 = vcvt.s32.f32 %v972_v10  ;;  %v911_v34 = vshra.s32 %v721_v12, %v2407_v14  ;;  %v913_v35 = vshra.s32 %v729_v13, %v2407_v14  ;;  %v910_v23 = vshra.s32 %v717_v17, %v2407_v14 }
  0xd3   : > { %v1487_v37 = vpack.c.bf16 %v1433_v21, %v1431_v18  ;;  %v1366_v41 = vmul.f32 %v1155_v2, %v1034_v26  ;;  %v912_v42 = vshra.s32 %v725_v27, %v2407_v14  ;;  %v529_v43 = vrot.slane %v501_v7, %v2403_v11 }
  0xd4   : > { %v1368_v44 = vmul.f32 %v1155_v2, %v1036_v32  ;;  %v975_v45 = vand.u32 15, %v911_v34  ;;  %v977_v46 = vand.u32 15, %v913_v35  ;;  %v974_v47 = vand.u32 15, %v910_v23 }
  0xd5   : > { %1534 = vmatprep.subr.bf16.mxu0 %v1487_v37  ;;  %v1430_v48 = vsub.f32 %v1366_v41, %v2566_v20  ;;  %v976_v50 = vand.u32 15, %v912_v42  ;;  %v737_v51 = vrot.slane %v515_v49, %v2411_v16  ;;  %v745_v52 = vrot.slane %v529_v43, %v2411_v16 }
  0xd6   : > { %v1432_v53 = vsub.f32 %v1368_v44, %v2566_v20  ;;  %v1039_v54 = vcvt.s32.f32 %v975_v45  ;;  %v1041_v38 = vcvt.s32.f32 %v977_v46  ;;  %v1038_v40 = vcvt.s32.f32 %v974_v47 }
  0xd7   : > { %v1040_v22 = vcvt.s32.f32 %v976_v50  ;;  %v915_v55 = vshra.s32 %v737_v51, %v2407_v14  ;;  %v917_v30 = vshra.s32 %v745_v52, %v2407_v14  ;;  %v1134_v56 = vcombine.high %v2502_v36, %v2502_v36 }
  0xd8   : > { %v1486_v57 = vpack.c.bf16 %v1432_v53, %v1430_v48  ;;  %v1371_v29 = vmul.f32 %v2552_v19, %v1039_v54  ;;  %v1373_v58 = vmul.f32 %v2552_v19, %v1041_v38  ;;  %v1370_v28 = vmul.f32 %v1155_v2, %v1038_v40 }
  0xd9   : > { %v1372_v61 = vmul.f32 %v1155_v2, %v1040_v22  ;;  %v979_v62 = vand.u32 15, %v915_v55  ;;  %v981_v63 = vand.u32 15, %v917_v30  ;;  %v2597_v0 = vrot.slane %v1134_v56, %v2411_v16  ;;  %v1919_v55 = vld [vmem:[%s361_s29 + $0x4] ss:$8 sps:$4 sm:$0xff]  }
  0xda   : > { %1535 = vmatpush1.bf16.msra.mxu0 %v1486_v57  ;;  %v1435_v1 = vsub.f32 %v1371_v29, %v2559_v59  ;;  %v1437_v31 = vsub.f32 %v1373_v58, %v2559_v59  ;;  %v1434_v3 = vsub.f32 %v1370_v28, %v2566_v20  ;;  %v1268_v36 = vcombine.high %v2508_v39, %v2508_v39 }
  0xdb   : > { %v1436_v4 = vsub.f32 %v1372_v61, %v2566_v20  ;;  %v1043_v19 = vcvt.s32.f32 %v979_v62  ;;  %v1045_v60 = vcvt.s32.f32 %v981_v63  ;;  %v733_v2 = vrot.slane %v515_v49, %v2409_v15 }
  0xdc   : > { %v1489_v5 = vpack.c.bf16 %v1437_v31, %v1435_v1  ;;  %v2607_v6 = vrot.slane %v1268_v36, %v2411_v16  ;;  %v741_v7 = vrot.slane %v529_v43, %v2409_v15  ;;  %v1163_v33 = vrot.slane %v1134_v56, %v2409_v15 }
  0xdd   : > { %v1488_v59 = vpack.c.bf16 %v1436_v4, %v1434_v3  ;;  %v1375_v8 = vmul.f32 %v2597_v0, %v1043_v19  ;;  %v1377_v9 = vmul.f32 %v2597_v0, %v1045_v60  ;;  %v914_v39 = vshra.s32 %v733_v2, %v2407_v14 }
  0xde   : > { %1536 = vmatprep.subr.bf16.mxu0 %v1489_v5  ;;  %v916_v20 = vshra.s32 %v741_v7, %v2407_v14  ;;  %v2616_v10 = vrot.slane %v1268_v36, %v2409_v15  ;;  %v531_v12 = vcombine.high %v515_v49, %v515_v49  ;;  %v533_v13 = vcombine.high %v529_v43, %v529_v43 }
  0xdf   : > { %1537 = vmatpush1.bf16.msra.mxu0 %v1488_v59  ;;  %v1439_v17 = vsub.f32 %v1375_v8, %v2607_v6  ;;  %v1441_v18 = vsub.f32 %v1377_v9, %v2607_v6  ;;  %v978_v21 = vand.u32 15, %v914_v39  ;;  %v550_v26 = vcombine.high %v2429_v24, %v2429_v24  ;;  %v1925_v39 = vld [vmem:[%s2386_s26 + $0x24] ss:$8 sps:$4 sm:$0xff]  }
  0xe0   : > { %v980_v27 = vand.u32 15, %v916_v20  ;;  %v753_v32 = vrot.slane %v531_v12, %v2411_v16  ;;  %v761_v34 = vrot.slane %v533_v13, %v2411_v16  ;;  %v749_v35 = vrot.slane %v531_v12, %v2409_v15 }
  0xe1   : > { %v1491_v23 = vpack.c.bf16 %v1441_v18, %v1439_v17  ;;  %v1042_v37 = vcvt.s32.f32 %v978_v21  ;;  %v757_v49 = vrot.slane %v533_v13, %v2409_v15  ;;  %v558_v41 = vrot.slane %v2429_v24, %v2403_v11 }
  0xe2   : > { %v1044_v42 = vcvt.s32.f32 %v980_v27  ;;  %v919_v43 = vshra.s32 %v753_v32, %v2407_v14  ;;  %v921_v44 = vshra.s32 %v761_v34, %v2407_v14  ;;  %v918_v45 = vshra.s32 %v749_v35, %v2407_v14 }
  0xe3   : > { %1538 = vmatprep.subr.bf16.mxu0 %v1491_v23  ;;  %v1374_v46 = vmul.f32 %v1163_v33, %v1042_v37  ;;  %v920_v47 = vshra.s32 %v757_v49, %v2407_v14  ;;  %v572_v48 = vrot.slane %v550_v26, %v2403_v11  ;;  %v769_v50 = vrot.slane %v558_v41, %v2411_v16 }
  0xe4   : > { %v1376_v51 = vmul.f32 %v1163_v33, %v1044_v42  ;;  %v983_v52 = vand.u32 15, %v919_v43  ;;  %v985_v53 = vand.u32 15, %v921_v44  ;;  %v982_v24 = vand.u32 15, %v918_v45 }
  0xe5   : > { %v1438_v54 = vsub.f32 %v1374_v46, %v2616_v10  ;;  %v984_v38 = vand.u32 15, %v920_v47  ;;  %v777_v40 = vrot.slane %v572_v48, %v2411_v16  ;;  %v923_v22 = vshra.s32 %v769_v50, %v2407_v14 }
  0xe6   : > { %v1440_v30 = vsub.f32 %v1376_v51, %v2616_v10  ;;  %v1047_v56 = vcvt.s32.f32 %v983_v52  ;;  %v1049_v57 = vcvt.s32.f32 %v985_v53  ;;  %v1046_v29 = vcvt.s32.f32 %v982_v24 }
  0xe7   : > { %v1048_v58 = vcvt.s32.f32 %v984_v38  ;;  %v925_v28 = vshra.s32 %v777_v40, %v2407_v14  ;;  %v987_v61 = vand.u32 15, %v923_v22  ;;  %v2643_v62 = vrot.slane %v2432_v25, %v2403_v11 }
  0xe8   : > { %v1490_v63 = vpack.c.bf16 %v1440_v30, %v1438_v54  ;;  %v1379_v1 = vmul.f32 %v2597_v0, %v1047_v56  ;;  %v1381_v31 = vmul.f32 %v2597_v0, %v1049_v57  ;;  %v1378_v3 = vmul.f32 %v1163_v33, %v1046_v29 }
  0xe9   : > { %v1380_v36 = vmul.f32 %v1163_v33, %v1048_v58  ;;  %v989_v4 = vand.u32 15, %v925_v28  ;;  %v1051_v19 = vcvt.s32.f32 %v987_v61  ;;  %v2649_v60 = vrot.slane %v2643_v62, %v2411_v16 }
  0xea   : > { %1539 = vmatpush1.bf16.msra.mxu0 %v1490_v63  ;;  %v1443_v2 = vsub.f32 %v1379_v1, %v2607_v6  ;;  %v1445_v5 = vsub.f32 %v1381_v31, %v2607_v6  ;;  %v1442_v7 = vsub.f32 %v1378_v3, %v2616_v10  ;;  %v2655_v59 = vrot.slane %v1919_v55, %v2403_v11 }
  0xeb   : > { %v1444_v0 = vsub.f32 %v1380_v36, %v2616_v10  ;;  %v1053_v8 = vcvt.s32.f32 %v989_v4  ;;  %v1383_v33 = vmul.f32 %v2649_v60, %v1051_v19  ;;  %v765_v9 = vrot.slane %v558_v41, %v2409_v15 }
  0xec   : > { %v1493_v20 = vpack.c.bf16 %v1445_v5, %v1443_v2  ;;  %v2663_v12 = vrot.slane %v2655_v59, %v2403_v11  ;;  %v773_v6 = vrot.slane %v572_v48, %v2409_v15  ;;  %v1171_v13 = vrot.slane %v2643_v62, %v2409_v15 }
  0xed   : > { %v1492_v17 = vpack.c.bf16 %v1444_v0, %v1442_v7  ;;  %v1385_v18 = vmul.f32 %v2649_v60, %v1053_v8  ;;  %v922_v10 = vshra.s32 %v765_v9, %v2407_v14  ;;  %v580_v21 = vcombine.high %v558_v41, %v558_v41 }
  0xee   : > { %1540 = vmatprep.subr.bf16.mxu0 %v1493_v20  ;;  %v1309_v26 = vrot.slane %v2663_v12, %v2411_v16  ;;  %v924_v27 = vshra.s32 %v773_v6, %v2407_v14  ;;  %v2675_v32 = vrot.slane %v2663_v12, %v2409_v15  ;;  %v582_v34 = vcombine.high %v572_v48, %v572_v48 }
  0xef   : > { %1541 = vmatpush1.bf16.msra.mxu0 %v1492_v17  ;;  %v986_v35 = vand.u32 15, %v922_v10  ;;  %v785_v23 = vrot.slane %v580_v21, %v2411_v16  ;;  %v781_v37 = vrot.slane %v580_v21, %v2409_v15  ;;  %v549_v49 = vrot.slane %v1925_v39, %v2403_v11 }
  0xf0   : > { %v1447_v41 = vsub.f32 %v1383_v33, %v1309_v26  ;;  %v1449_v42 = vsub.f32 %v1385_v18, %v1309_v26  ;;  %v988_v43 = vand.u32 15, %v924_v27  ;;  %v793_v44 = vrot.slane %v582_v34, %v2411_v16 }
  0xf1   : > { %v1050_v45 = vcvt.s32.f32 %v986_v35  ;;  %v927_v46 = vshra.s32 %v785_v23, %v2407_v14  ;;  %v789_v47 = vrot.slane %v582_v34, %v2409_v15  ;;  %v926_v48 = vshra.s32 %v781_v37, %v2407_v14 }
  0xf2   : > { %v1495_v50 = vpack.c.bf16 %v1449_v42, %v1447_v41  ;;  %v1052_v51 = vcvt.s32.f32 %v988_v43  ;;  %v929_v52 = vshra.s32 %v793_v44, %v2407_v14  ;;  %v551_v53 = vcombine.high %v549_v49, %v549_v49 }
  0xf3   : > { %v1382_v24 = vmul.f32 %v1171_v13, %v1050_v45  ;;  %v991_v54 = vand.u32 15, %v927_v46  ;;  %v928_v38 = vshra.s32 %v789_v47, %v2407_v14  ;;  %v990_v40 = vand.u32 15, %v926_v48 }
  0xf4   : > { %1542 = vmatprep.subr.bf16.mxu0 %v1495_v50  ;;  %v1384_v22 = vmul.f32 %v1171_v13, %v1052_v51  ;;  %v993_v55 = vand.u32 15, %v929_v52  ;;  %v565_v30 = vrot.slane %v549_v49, %v2403_v11  ;;  %v579_v56 = vrot.slane %v551_v53, %v2403_v11 }
  0xf5   : > { %v1446_v57 = vsub.f32 %v1382_v24, %v2675_v32  ;;  %v1055_v29 = vcvt.s32.f32 %v991_v54  ;;  %v992_v58 = vand.u32 15, %v928_v38  ;;  %v1054_v28 = vcvt.s32.f32 %v990_v40 }
  0xf6   : > { %v1448_v61 = vsub.f32 %v1384_v22, %v2675_v32  ;;  %v1057_v63 = vcvt.s32.f32 %v993_v55  ;;  %v801_v1 = vrot.slane %v565_v30, %v2411_v16  ;;  %v809_v31 = vrot.slane %v579_v56, %v2411_v16 }
  0xf7   : > { %v1387_v3 = vmul.f32 %v2649_v60, %v1055_v29  ;;  %v1056_v36 = vcvt.s32.f32 %v992_v58  ;;  %v1386_v4 = vmul.f32 %v1171_v13, %v1054_v28  ;;  %v1103_v19 = vcombine.high %v2432_v25, %v2432_v25 }
  0xf8   : > { %v1494_v2 = vpack.c.bf16 %v1448_v61, %v1446_v57  ;;  %v1389_v5 = vmul.f32 %v2649_v60, %v1057_v63  ;;  %v931_v7 = vshra.s32 %v801_v1, %v2407_v14  ;;  %v933_v0 = vshra.s32 %v809_v31, %v2407_v14 }
  0xf9   : > { %v1451_v8 = vsub.f32 %v1387_v3, %v1309_v26  ;;  %v1388_v33 = vmul.f32 %v1171_v13, %v1056_v36  ;;  %v1450_v9 = vsub.f32 %v1386_v4, %v2675_v32  ;;  %v2700_v39 = vrot.slane %v1103_v19, %v2403_v11 }
  0xfa   : > { %1543 = vmatpush1.bf16.msra.mxu0 %v1494_v2  ;;  %v1453_v20 = vsub.f32 %v1389_v5, %v1309_v26  ;;  %v995_v6 = vand.u32 15, %v931_v7  ;;  %v997_v17 = vand.u32 15, %v933_v0  ;;  %v1237_v25 = vcombine.high %v2655_v59, %v2655_v59  ;;  %v1926_v26 = vld [vmem:[%s2386_s26 + $0x30] ss:$8 sps:$4 sm:$0xff]  }
  0xfb   : > { %v1452_v60 = vsub.f32 %v1388_v33, %v2675_v32  ;;  %v1183_v18 = vrot.slane %v2700_v39, %v2411_v16  ;;  %v797_v13 = vrot.slane %v565_v30, %v2409_v15  ;;  %v805_v10 = vrot.slane %v579_v56, %v2409_v15 }
  0xfc   : > { %v1497_v21 = vpack.c.bf16 %v1453_v20, %v1451_v8  ;;  %v1059_v27 = vcvt.s32.f32 %v995_v6  ;;  %v1061_v34 = vcvt.s32.f32 %v997_v17  ;;  %v2710_v35 = vrot.slane %v1237_v25, %v2403_v11 }
  0xfd   : > { %v1496_v23 = vpack.c.bf16 %v1452_v60, %v1450_v9  ;;  %v930_v37 = vshra.s32 %v797_v13, %v2407_v14  ;;  %v932_v59 = vshra.s32 %v805_v10, %v2407_v14  ;;  %v1179_v32 = vrot.slane %v2700_v39, %v2409_v15 }
  0xfe   : > { %1544 = vmatprep.subr.bf16.mxu0 %v1497_v21  ;;  %v2719_v49 = vrot.slane %v2710_v35, %v2411_v16  ;;  %v1391_v41 = vmul.f32 %v1183_v18, %v1059_v27  ;;  %v1393_v42 = vmul.f32 %v1183_v18, %v1061_v34  ;;  %v2723_v43 = vrot.slane %v2710_v35, %v2409_v15 }
  0xff   : > { %1545 = vmatpush1.bf16.msra.mxu0 %v1496_v23  ;;  %v994_v44 = vand.u32 15, %v930_v37  ;;  %v996_v45 = vand.u32 15, %v932_v59  ;;  %v581_v46 = vcombine.high %v565_v30, %v565_v30  ;;  %v583_v47 = vcombine.high %v579_v56, %v579_v56 }
 0x100   : > { %v1455_v48 = vsub.f32 %v1391_v41, %v2719_v49  ;;  %v1457_v50 = vsub.f32 %v1393_v42, %v2719_v49  ;;  %v592_v51 = vrot.slane %v1926_v26, %v2403_v11  ;;  %v1133_v52 = vcombine.high %v2643_v62, %v2643_v62 }
 0x101   : > { %v1058_v53 = vcvt.s32.f32 %v994_v44  ;;  %v1060_v24 = vcvt.s32.f32 %v996_v45  ;;  %v817_v54 = vrot.slane %v581_v46, %v2411_v16  ;;  %v825_v38 = vrot.slane %v583_v47, %v2411_v16  ;;  %v1928_v45 = vld [vmem:[%s2386_s26 + $0x34] ss:$8 sps:$4 sm:$0xff]  }
 0x102   : > { %v1499_v40 = vpack.c.bf16 %v1457_v50, %v1455_v48  ;;  %v813_v22 = vrot.slane %v581_v46, %v2409_v15  ;;  %v821_v55 = vrot.slane %v583_v47, %v2409_v15  ;;  %v600_v30 = vcombine.high %v592_v51, %v592_v51 }
 0x103   : > { %v1390_v56 = vmul.f32 %v1179_v32, %v1058_v53  ;;  %v1392_v57 = vmul.f32 %v1179_v32, %v1060_v24  ;;  %v935_v29 = vshra.s32 %v817_v54, %v2407_v14  ;;  %v937_v58 = vshra.s32 %v825_v38, %v2407_v14 }
 0x104   : > { %1546 = vmatprep.subr.bf16.mxu0 %v1499_v40  ;;  %v934_v62 = vshra.s32 %v813_v22, %v2407_v14  ;;  %v936_v28 = vshra.s32 %v821_v55, %v2407_v14  ;;  %v608_v61 = vrot.slane %v592_v51, %v2403_v11  ;;  %v622_v63 = vrot.slane %v600_v30, %v2403_v11 }
 0x105   : > { %v1454_v1 = vsub.f32 %v1390_v56, %v2723_v43  ;;  %v1456_v31 = vsub.f32 %v1392_v57, %v2723_v43  ;;  %v999_v3 = vand.u32 15, %v935_v29  ;;  %v1001_v36 = vand.u32 15, %v937_v58 }
 0x106   : > { %v998_v4 = vand.u32 15, %v934_v62  ;;  %v1000_v19 = vand.u32 15, %v936_v28  ;;  %v833_v2 = vrot.slane %v608_v61, %v2411_v16  ;;  %v841_v5 = vrot.slane %v622_v63, %v2411_v16 }
 0x107   : > { %v1498_v7 = vpack.c.bf16 %v1456_v31, %v1454_v1  ;;  %v1063_v0 = vcvt.s32.f32 %v999_v3  ;;  %v1065_v8 = vcvt.s32.f32 %v1001_v36  ;;  %v2745_v33 = vrot.slane %v1133_v52, %v2411_v16 }
 0x108   : > { %v1062_v9 = vcvt.s32.f32 %v998_v4  ;;  %v1064_v20 = vcvt.s32.f32 %v1000_v19  ;;  %v939_v6 = vshra.s32 %v833_v2, %v2407_v14  ;;  %v941_v17 = vshra.s32 %v841_v5, %v2407_v14 }
 0x109   : > { %1547 = vmatpush1.bf16.msra.mxu0 %v1498_v7  ;;  %v1395_v25 = vmul.f32 %v1183_v18, %v1063_v0  ;;  %v1397_v60 = vmul.f32 %v1183_v18, %v1065_v8  ;;  %v1267_v13 = vcombine.high %v2663_v12, %v2663_v12  ;;  %v829_v10 = vrot.slane %v608_v61, %v2409_v15 }
 0x10a   : > { %v1394_v21 = vmul.f32 %v1179_v32, %v1062_v9  ;;  %v1396_v27 = vmul.f32 %v1179_v32, %v1064_v20  ;;  %v1003_v34 = vand.u32 15, %v939_v6  ;;  %v1005_v26 = vand.u32 15, %v941_v17 }
 0x10b   : > { %v1459_v23 = vsub.f32 %v1395_v25, %v2719_v49  ;;  %v1461_v37 = vsub.f32 %v1397_v60, %v2719_v49  ;;  %v2755_v59 = vrot.slane %v1267_v13, %v2411_v16  ;;  %v837_v41 = vrot.slane %v622_v63, %v2409_v15 }
 0x10c   : > { %v1458_v18 = vsub.f32 %v1394_v21, %v2723_v43  ;;  %v1460_v42 = vsub.f32 %v1396_v27, %v2723_v43  ;;  %v1067_v12 = vcvt.s32.f32 %v1003_v34  ;;  %v1069_v44 = vcvt.s32.f32 %v1005_v26 }
 0x10d   : > { %v1501_v46 = vpack.c.bf16 %v1461_v37, %v1459_v23  ;;  %v938_v32 = vshra.s32 %v829_v10, %v2407_v14  ;;  %v940_v47 = vshra.s32 %v837_v41, %v2407_v14  ;;  %v1187_v48 = vrot.slane %v1133_v52, %v2409_v15 }
 0x10e   : > { %v1500_v49 = vpack.c.bf16 %v1460_v42, %v1458_v18  ;;  %v1399_v50 = vmul.f32 %v2745_v33, %v1067_v12  ;;  %v1401_v51 = vmul.f32 %v2745_v33, %v1069_v44  ;;  %v2767_v53 = vrot.slane %v1267_v13, %v2409_v15 }
 0x10f   : > { %1548 = vmatprep.subr.bf16.mxu0 %v1501_v46  ;;  %v1002_v43 = vand.u32 15, %v938_v32  ;;  %v1004_v24 = vand.u32 15, %v940_v47  ;;  %v630_v54 = vcombine.high %v608_v61, %v608_v61  ;;  %v632_v38 = vcombine.high %v622_v63, %v622_v63 }
 0x110   : > { %1549 = vmatpush1.bf16.msra.mxu0 %v1500_v49  ;;  %v1463_v40 = vsub.f32 %v1399_v50, %v2755_v59  ;;  %v1465_v22 = vsub.f32 %v1401_v51, %v2755_v59  ;;  %v599_v52 = vrot.slane %v1928_v45, %v2403_v11  ;;  %v1135_v55 = vcombine.high %v2700_v39, %v2700_v39 }
 0x111   : > { %v1066_v30 = vcvt.s32.f32 %v1002_v43  ;;  %v1068_v56 = vcvt.s32.f32 %v1004_v24  ;;  %v849_v57 = vrot.slane %v630_v54, %v2411_v16  ;;  %v857_v29 = vrot.slane %v632_v38, %v2411_v16 }
 0x112   : > { %v1503_v58 = vpack.c.bf16 %v1465_v22, %v1463_v40  ;;  %v845_v62 = vrot.slane %v630_v54, %v2409_v15  ;;  %v853_v28 = vrot.slane %v632_v38, %v2409_v15  ;;  %v601_v61 = vcombine.high %v599_v52, %v599_v52 }
 0x113   : > { %v1398_v63 = vmul.f32 %v1187_v48, %v1066_v30  ;;  %v1400_v1 = vmul.f32 %v1187_v48, %v1068_v56  ;;  %v943_v31 = vshra.s32 %v849_v57, %v2407_v14  ;;  %v945_v3 = vshra.s32 %v857_v29, %v2407_v14 }
 0x114   : > { %1550 = vmatprep.subr.bf16.mxu0 %v1503_v58  ;;  %v942_v39 = vshra.s32 %v845_v62, %v2407_v14  ;;  %v944_v36 = vshra.s32 %v853_v28, %v2407_v14  ;;  %v615_v4 = vrot.slane %v599_v52, %v2403_v11  ;;  %v629_v19 = vrot.slane %v601_v61, %v2403_v11 }
 0x115   : > { %v1462_v2 = vsub.f32 %v1398_v63, %v2767_v53  ;;  %v1464_v5 = vsub.f32 %v1400_v1, %v2767_v53  ;;  %v1007_v7 = vand.u32 15, %v943_v31  ;;  %v1009_v0 = vand.u32 15, %v945_v3 }
 0x116   : > { %v1006_v8 = vand.u32 15, %v942_v39  ;;  %v1008_v9 = vand.u32 15, %v944_v36  ;;  %v865_v20 = vrot.slane %v615_v4, %v2411_v16  ;;  %v873_v6 = vrot.slane %v629_v19, %v2411_v16 }
 0x117   : > { %v1502_v17 = vpack.c.bf16 %v1464_v5, %v1462_v2  ;;  %v1071_v25 = vcvt.s32.f32 %v1007_v7  ;;  %v1073_v60 = vcvt.s32.f32 %v1009_v0  ;;  %v2789_v13 = vrot.slane %v1135_v55, %v2411_v16 }
 0x118   : > { %v1070_v10 = vcvt.s32.f32 %v1006_v8  ;;  %v1072_v11 = vcvt.s32.f32 %v1008_v9  ;;  %v947_v21 = vshra.s32 %v865_v20, %v2407_v14  ;;  %v949_v27 = vshra.s32 %v873_v6, %v2407_v14 }
 0x119   : > { %1551 = vmatpush1.bf16.msra.mxu0 %v1502_v17  ;;  %v1403_v34 = vmul.f32 %v2745_v33, %v1071_v25  ;;  %v1405_v26 = vmul.f32 %v2745_v33, %v1073_v60  ;;  %v1269_v23 = vcombine.high %v2710_v35, %v2710_v35  ;;  %v861_v37 = vrot.slane %v615_v4, %v2409_v15 }
 0x11a   : > { %v1402_v41 = vmul.f32 %v1187_v48, %v1070_v10  ;;  %v1404_v18 = vmul.f32 %v1187_v48, %v1072_v11  ;;  %v1011_v42 = vand.u32 15, %v947_v21  ;;  %v1013_v12 = vand.u32 15, %v949_v27 }
 0x11b   : > { %v1467_v44 = vsub.f32 %v1403_v34, %v2755_v59  ;;  %v1469_v45 = vsub.f32 %v1405_v26, %v2755_v59  ;;  %v1333_v46 = vrot.slane %v1269_v23, %v2411_v16  ;;  %v869_v32 = vrot.slane %v629_v19, %v2409_v15 }
 0x11c   : > { %v1466_v47 = vsub.f32 %v1402_v41, %v2767_v53  ;;  %v1468_v33 = vsub.f32 %v1404_v18, %v2767_v53  ;;  %v1075_v49 = vcvt.s32.f32 %v1011_v42  ;;  %v1077_v35 = vcvt.s32.f32 %v1013_v12  ;;  %v1510_v41 = vld [vmem:[#allocation2] sm:$0xff]  ;;  %v1511_v18 = vld [vmem:[#allocation2 + $0x8] sm:$0xff]  ;;  %v1512_v12 = vld [vmem:[#allocation2 + $0x10] sm:$0xff] }
 0x11d   : > { %v1505_v50 = vpack.c.bf16 %v1469_v45, %v1467_v44  ;;  %v946_v51 = vshra.s32 %v861_v37, %v2407_v14  ;;  %v948_v48 = vshra.s32 %v869_v32, %v2407_v14  ;;  %v1195_v54 = vrot.slane %v1135_v55, %v2409_v15  ;;  %v1929_v37 = vld [vmem:[%s334_s11] ss:$8 sps:$4 sm:$0xff]  }
 0x11e   : > { %v1504_v43 = vpack.c.bf16 %v1468_v33, %v1466_v47  ;;  %v1407_v24 = vmul.f32 %v2789_v13, %v1075_v49  ;;  %v1409_v59 = vmul.f32 %v2789_v13, %v1077_v35  ;;  %v631_v22 = vcombine.high %v615_v4, %v615_v4 }
 0x11f   : > { %1552 = vmatprep.subr.bf16.mxu0 %v1505_v50  ;;  %v1010_v38 = vand.u32 15, %v946_v51  ;;  %v1012_v40 = vand.u32 15, %v948_v48  ;;  %v633_v52 = vcombine.high %v629_v19, %v629_v19  ;;  %v1329_v56 = vrot.slane %v1269_v23, %v2409_v15  ;;  %v1585_v51 = vld [vmem:[%s2873_s4] sm:$0x3] (!%p1812_p3) }
 0x120   : > { %1553 = vmatpush1.bf16.msra.mxu0 %v1504_v43  ;;  %v1471_v53 = vsub.f32 %v1407_v24, %v1333_v46  ;;  %v1473_v30 = vsub.f32 %v1409_v59, %v1333_v46  ;;  %v881_v58 = vrot.slane %v631_v22, %v2411_v16  ;;  %v877_v61 = vrot.slane %v631_v22, %v2409_v15 }
 0x121   : > { %v1074_v57 = vcvt.s32.f32 %v1010_v38  ;;  %v1076_v29 = vcvt.s32.f32 %v1012_v40  ;;  %v889_v62 = vrot.slane %v633_v52, %v2411_v16  ;;  %v885_v55 = vrot.slane %v633_v52, %v2409_v15 }
 0x122   : > { %v1507_v28 = vpack.c.bf16 %v1473_v30, %v1471_v53  ;;  %v951_v31 = vshra.s32 %v881_v58, %v2407_v14  ;;  %v950_v39 = vshra.s32 %v877_v61, %v2407_v14  ;;  %v1590_v48 = vrot.slane (!%p1812_p3), %v1585_v51, %v2409_v15 }
 0x123   : > { %v1406_v63 = vmul.f32 %v1195_v54, %v1074_v57  ;;  %v1408_v1 = vmul.f32 %v1195_v54, %v1076_v29  ;;  %v953_v3 = vshra.s32 %v889_v62, %v2407_v14  ;;  %v952_v36 = vshra.s32 %v885_v55, %v2407_v14 }
 0x124   : > { %1554 = vmatprep.subr.bf16.mxu0 %v1507_v28  ;;  %v1015_v2 = vand.u32 15, %v951_v31  ;;  %v1014_v7 = vand.u32 15, %v950_v39  ;;  %v1594_v43 = vrot.slane (!%p1812_p3), %v1585_v51, %v2411_v16 }
 0x125   : > { %v1470_v4 = vsub.f32 %v1406_v63, %v1329_v56  ;;  %v1472_v19 = vsub.f32 %v1408_v1, %v1329_v56  ;;  %v1017_v5 = vand.u32 15, %v953_v3  ;;  %v1016_v0 = vand.u32 15, %v952_v36 }
 0x126   : > { %v1079_v9 = vcvt.s32.f32 %v1015_v2  ;;  %v1078_v6 = vcvt.s32.f32 %v1014_v7 }
 0x127   : > { %v1506_v8 = vpack.c.bf16 %v1472_v19, %v1470_v4  ;;  %v1081_v20 = vcvt.s32.f32 %v1017_v5  ;;  %v1080_v17 = vcvt.s32.f32 %v1016_v0 }
 0x128   : > { %v1411_v25 = vmul.f32 %v2789_v13, %v1079_v9  ;;  %v1410_v10 = vmul.f32 %v1195_v54, %v1078_v6 }
 0x129   : > { %1555 = vmatpush1.bf16.msra.mxu0 %v1506_v8  ;;  %v1413_v60 = vmul.f32 %v2789_v13, %v1081_v20  ;;  %v1412_v11 = vmul.f32 %v1195_v54, %v1080_v17  ;;  %v1513_v13 = vld [vmem:[#allocation2 + $0x18] sm:$0xff] }
 0x12a   : > { %v1475_v14 = vsub.f32 %v1411_v25, %v1333_v46  ;;  %v1474_v27 = vsub.f32 %v1410_v10, %v1329_v56 }
 0x12b   : > { %v1477_v21 = vsub.f32 %v1413_v60, %v1333_v46  ;;  %v1476_v34 = vsub.f32 %v1412_v11, %v1329_v56 }
 0x12d   : > { %v1509_v26 = vpack.c.bf16 %v1477_v21, %v1475_v14  ;;  %v1508_v23 = vpack.c.bf16 %v1476_v34, %v1474_v27 }
 0x12f   : > { %1556 = vmatprep.subr.bf16.mxu0 %v1509_v26 }
 0x130   : > { %1557 = vmatpush1.bf16.msra.mxu0 %v1508_v23 }
 0x133   : > { %1559 = vmatmul.mubr.bf16.vlgmr.msra.gmra.mrb[0].mxu0 %v1929_v37 }
 0x206   : > { %v1560_v42 = vpop.f32.mrb[0].mxu0  ;;  %1580 = sbr.rel (%p1812_p3) target bundleno = 537 (0x219), region = 64 }
 0x207   : > { %v1569_v44 = vadd.f32 %v1560_v42, %v1510_v41  ;;  %v1562_v45 = vpop.f32.mrb[1].mxu0 }
 0x208   : > { %v1570_v32 = vadd.f32 %v1562_v45, %v1511_v18  ;;  %v1564_v47 = vpop.f32.mrb[2].mxu0 }
 0x209   : > { %1573 = vst [vmem:[#allocation2] sm:$0xff] %v1569_v44  ;;  %v1571_v46 = vadd.f32 %v1564_v47, %v1512_v12  ;;  %v1566_v33 = vpop.f32.mrb[3].mxu0 }
 0x20a   : > { %1574 = vst [vmem:[#allocation2 + $0x8] sm:$0xff] %v1570_v32  ;;  %v1572_v49 = vadd.f32 %v1566_v33, %v1513_v13 }
 0x20b   : > { %1575 = vst [vmem:[#allocation2 + $0x10] sm:$0xff] %v1571_v46 }
 0x20c   : > { %1576 = vst [vmem:[#allocation2 + $0x18] sm:$0xff] %v1572_v49 }
 0x210   : > { %v1581_v35 = vld [vmem:[#allocation2] sm:$0xff] }
 0x211   : > { %v1582_v50 = vld [vmem:[#allocation2 + $0x8] sm:$0xff]  ;;  %v1597_v54 = vadd.f32 %v1590_v48, %v1581_v35 }
 0x212   : > { %v1583_v24 = vld [vmem:[#allocation2 + $0x10] sm:$0xff]  ;;  %v1598_v38 = vadd.f32 %v1594_v43, %v1582_v50 }
 0x213   : > { %v1584_v59 = vld [vmem:[#allocation2 + $0x18] sm:$0xff]  ;;  %v1599_v40 = vadd.f32 %v1590_v48, %v1583_v24 }
 0x214   : > { %v1600_v22 = vadd.f32 %v1594_v43, %v1584_v59  ;;  %v1824_v52 = vpack.c.bf16 %v1598_v38, %v1597_v54 }
 0x216   : > { %v1825_v53 = vpack.c.bf16 %v1600_v22, %v1599_v40  ;;  %1613 = vst [vmem:[#allocation11] sm:$0xff] %v1824_v52 }
 0x218   : > { %1614 = vst [vmem:[#allocation11 + $0x8] sm:$0xff] %v1825_v53 }
 0x219 PF: > { %p1852_p4 = scmp.eq.s32.totalorder %s2214_s24, 1  ;;  %s2152_s21 = smov [#allocation11]  }
 0x21a   : > { %s1627_s9 = sshll.u32 %s2152_s21, 4  ;;  %s1628_s9 = int_to_ptr.vmem [resolvable:$true] %s1627_s9 }
 0x21b   : > { %s2052_s7 = scalar_lea.vmem %s1628_s9, 256  ;;  %p2059_p5 = scmp.lt.s32.totalorder %s1628_s9, %s1628_s9 }
 0x21c   : > { %p2053_p6 = scmp.ne.s32.totalorder %s1628_s9, %s2052_s7  ;;  %p2060_p1 = scmp.lt.s32.totalorder %s2052_s7, %s2052_s7 }
 0x21e   : > { %p2054_p8 = pnand %p2053_p6, %p1852_p4  ;;  %p2061_p9 = por %p2060_p1, %p2059_p5 }
 0x220   : > { %p2055_p10 = pneg %p2054_p8 }
 0x222   : > { %p2062_p11 = pnand %p2061_p9, %p2055_p10 }
 0x224   : > { %2065 = shalt.err (!%p2062_p11)
}
 0x225   : > { %s2902_s18 = sld [smem:[#allocation22_spill]] }
 0x22b   : > { %s2903_s12 = smov %s2902_s18  ;;  %s2066_s16 = scalar_lea.hbm %s2902_s18, 256 }
 0x22c   : > { %p2067_p0 = scmp.ne.s32.totalorder %s2903_s12, %s2066_s16  ;;  %p2072_p12 = scmp.lt.u32.totalorder %s2066_s16, %s2903_s12 }
 0x22e   : > { %p2068_p7 = pnand %p2067_p0, %p1852_p4 }
 0x230   : > { %p2069_p2 = pneg %p2068_p7 }
 0x232   : > { %p2074_p13 = pnand %p2072_p12, %p2069_p2 }
 0x234   : > { %2077 = shalt.err (!%p2074_p13)
}
 0x235   : > { %s2153_s17 = smov 128   ;;  %s2154_s0 = smov 8  }
 0x236   : > { %1835 = dma.vmem_to_hbm [thread:$0]  (%p1852_p4), %s1628_s9, 256, %s2903_s12, [#allocation5], %s2153_s17, %s2153_s17, %s2154_s0  }
 0x237   : > { %2115 = dma.done.wait (%p1852_p4), [#allocation5], 256  }
 0x238   : > { %2117 = vsyncadd (%p1852_p4), [#allocation5], 4294967040 }
 0x239 PF: > { %s2904_s6 = sld [smem:[#allocation17_spill]]  ;;  %s2905_s20 = sld [smem:[#allocation16_spill]] }
 0x23a   : > { %s2906_s5 = sld [smem:[#allocation19_spill]]  ;;  %s2907_s26 = sld [smem:[#allocation18_spill]] }
 0x23b   : > { %s2908_s18 = smov %s2124_s19  ;;  %s2911_s21 = smov %s2136_s22 }
 0x23f   : > { %s25_s23 = sadd.s32 1, %s2904_s6   ;;  %s2909_s19 = smov %s2905_s20 }
 0x240   : > { %p22_p3 = scmp.ge.s32.totalorder %s25_s23, 4   ;;  %s2910_s20 = smov %s2906_s5 }
 0x241   : > { %s2912_s22 = smov %s2907_s26 }
 0x242   :  { %24 = sbr.rel (!%p22_p3) target bundleno = 13 (0xd), region = 126 }
 0x249   :  { %1643 = vsyncpa [#allocation4], 1 }
 0x24a   :  { %1645 = vsyncpa [#allocation4 + $0x1], 1 }
 0x24b   :  { %1646 = vsyncpa [#allocation7], 1 }
 0x24c   :  { %1648 = vsyncpa [#allocation7 + $0x1], 1 }
 0x24d   :  { %1649 = vsyncpa [#allocation10], 1 }
 0x24e   :  { %1651 = vsyncpa [#allocation10 + $0x1], 1 }
 0x24f   :  { %1652 = vsyncpa [#allocation5], 1 }
 0x250   :  { %1654 = vsyncpa [#allocation5 + $0x1], 1 }

</bundles_post_ra>
